<compile_context>
chip_gen: v7x
topology: tpu7x:2x2x1
jax: 0.10.0
libtpu: 0.0.40
codegen_flags: <defaults>
</compile_context>

<pallas_src>
import jax
import jax.numpy as jnp
import numpy as np
from jax.experimental import pallas as pl

LANE = 128  # pad the output-channel dim up to full lane width


def _uniform_from_hash(shape, seed):
    """Counter-based hash -> uniform float32 in [0, 1). Pure jnp ops."""
    row = jax.lax.broadcasted_iota(jnp.int32, shape, 0)
    col = jax.lax.broadcasted_iota(jnp.int32, shape, 1)
    h = (row * shape[1] + col).astype(jnp.uint32)
    h = h + jnp.uint32((int(seed) * 2654435761) & 0xFFFFFFFF)
    # murmur3-style finalizer (good avalanche, all 32-bit VPU ops)
    h = h ^ (h >> jnp.uint32(16))
    h = h * jnp.uint32(0x7FEB352D)
    h = h ^ (h >> jnp.uint32(15))
    h = h * jnp.uint32(0x846CA68B)
    h = h ^ (h >> jnp.uint32(16))
    mant = (h >> jnp.uint32(8)).astype(jnp.int32)          # 24 random bits
    return mant.astype(jnp.float32) * jnp.float32(1.0 / (1 << 24))


def make_fused_kernel(T, BW, CP, seed):
    def kernel(p_ref, w_ref, conv_ref, spk_ref):
        # p_ref    : (BW, 3L)    im2col patches
        # w_ref    : (3L, CP)    lane-padded conv weights
        # conv_ref : (BW, CP)    conv output (already in (b,w,c) order, padded)
        # spk_ref  : (T, BW, CP) Poisson spikes, identical across T
        y = jnp.dot(p_ref[...], w_ref[...],
                    preferred_element_type=jnp.float32)     # single MXU matmul
        conv_ref[...] = y
        u = _uniform_from_hash((BW, CP), seed)
        spk = (u <= y).astype(jnp.float32)                  # torch.rand.le(x)
        for t in range(T):                                   # static unroll
            spk_ref[t] = spk
    return kernel


def network_forward(x, conv0_w, T, seed=0):
    """x: (B, L, W) f32, conv0_w: (C_L, L, 3) f32 (torch Conv1d layout).

    Returns:
      x_conv0   : (B, W, C_L)     == conv0(x).swapaxes(2, 1)
      x_encoder : (T, B, W, C_L)  == PoissonEncoder(x_conv0) repeated T times
    """
    B, L, W = x.shape
    C_L = conv0_w.shape[0]
    CP = ((C_L + LANE - 1) // LANE) * LANE
    BW, K3L = B * W, 3 * L

    # im2col patches: P[b*W + w, k*L + l] = x_pad[b, l, w + k]
    xp = jnp.pad(x, ((0, 0), (0, 0), (1, 1)))                     # (B, L, W+2)
    p = jnp.stack([xp[:, :, k:k + W] for k in range(3)], axis=1)  # (B, 3, L, W)
    p = jnp.transpose(p, (0, 3, 1, 2)).reshape(BW, K3L)           # (BW, 3L)

    # lane-dense weight matrix: Wm[k*L + l, c] = conv0_w[c, l, k], padded to CP
    wm = jnp.transpose(conv0_w, (2, 1, 0)).reshape(K3L, C_L)
    wm = jnp.pad(wm, ((0, 0), (0, CP - C_L)))

    conv_out, spk_out = pl.pallas_call(
        make_fused_kernel(T, BW, CP, seed),
        out_shape=(jax.ShapeDtypeStruct((BW, CP), jnp.float32),
                   jax.ShapeDtypeStruct((T, BW, CP), jnp.float32)),
        in_specs=[pl.BlockSpec((BW, K3L), lambda: (0, 0)),
                  pl.BlockSpec((K3L, CP), lambda: (0, 0))],
        out_specs=(pl.BlockSpec((BW, CP), lambda: (0, 0)),
                   pl.BlockSpec((T, BW, CP), lambda: (0, 0, 0))),
    )(p, wm)

    x_conv0 = conv_out[:, :C_L].reshape(B, W, C_L)
    x_encoder = spk_out[:, :, :C_L].reshape(T, B, W, C_L)
    # TODO(synk): LIF_FractalNet is not defined in the provided source; its
    # forward cannot be reproduced, so the encoded spike train is returned.
    return x_conv0, x_encoder


if __name__ == "__main__":
    # Small shapes implied by the module:
    #   data_shape = (length, channel); Conv1d(in=length, out=C_L, k=3, same)
    B, length, channel = 2, 8, 16
    C_L, T = 32, 4

    key = jax.random.PRNGKey(0)
    kx, kw = jax.random.split(key)
    x = jax.random.normal(kx, (B, length, channel), dtype=jnp.float32)
    fan_in = length * 3
    bound = float(np.sqrt(1.0 / fan_in))
    conv0_w = jax.random.uniform(kw, (C_L, length, 3),
                                 minval=-bound, maxval=bound,
                                 dtype=jnp.float32)

    x_conv0, x_encoder = network_forward(x, conv0_w, T, seed=0)
    jax.block_until_ready((x_conv0, x_encoder))

    # conv hot-path correctness vs XLA's conv
    ref = jax.lax.conv_general_dilated(
        x, conv0_w, window_strides=(1,), padding="SAME",
        dimension_numbers=("NCH", "OIH", "NCH"))
    ref = jnp.swapaxes(ref, 1, 2)
    assert np.allclose(np.asarray(x_conv0), np.asarray(ref), atol=1e-5), \
        "conv kernel mismatch"

    enc = np.asarray(x_encoder)
    assert x_encoder.shape == (T, B, channel, C_L)
    # spikes are binary
    assert np.all((enc == 0.0) | (enc == 1.0))
    # encoder is applied once and repeated across T (matches reference forward)
    assert all(np.array_equal(enc[0], enc[t]) for t in range(T))
    # Bernoulli(p = y clipped to [0,1]) sanity: y < 0 never spikes, y >= 1 always
    y_np = np.asarray(x_conv0)
    assert np.all(enc[0][y_np < 0.0] == 0.0)
    assert np.all(enc[0][y_np >= 1.0] == 1.0)

    print("KERNEL_OK")
</pallas_src>

<mosaic_0001>
module attributes {stable_mosaic.version = 11 : i64} {
  func.func @kernel(%arg0: memref<32x24xf32, #tpu.memory_space<vmem>>, %arg1: memref<24x128xf32, #tpu.memory_space<vmem>>, %arg2: memref<32x128xf32, #tpu.memory_space<vmem>>, %arg3: memref<4x32x128xf32, #tpu.memory_space<vmem>>) attributes {dimension_semantics = [], scalar_prefetch = 0 : i64, scratch_operands = 0 : i64, tpu.core_type = #tpu.core_type<tc>} {
    %c0 = arith.constant 0 : index
    %c0_0 = arith.constant 0 : index
    %0 = vector.load %arg0[%c0, %c0_0] : memref<32x24xf32, #tpu.memory_space<vmem>>, vector<32x24xf32>
    %c0_1 = arith.constant 0 : index
    %c0_2 = arith.constant 0 : index
    %1 = vector.load %arg1[%c0_1, %c0_2] : memref<24x128xf32, #tpu.memory_space<vmem>>, vector<24x128xf32>
    %cst = arith.constant dense<0.000000e+00> : vector<32x128xf32>
    %2 = tpu.matmul %0, %1, %cst {dimension_numbers = #tpu.dot_dimension_numbers<[1], [0], [0], [1], [0, 0, 1, 1], [], []>} : vector<32x24xf32>, vector<24x128xf32>, vector<32x128xf32> -> vector<32x128xf32>
    %c0_3 = arith.constant 0 : index
    %c0_4 = arith.constant 0 : index
    %3 = vector.load %arg2[%c0_3, %c0_4] : memref<32x128xf32, #tpu.memory_space<vmem>>, vector<32x128xf32>
    tpu.vector_store %arg2[%c0_3, %c0_4], %2 {strides = array<i32>} : memref<32x128xf32, #tpu.memory_space<vmem>>, vector<32x128xf32>,
    %4 = tpu.iota {dimensions = array<i32: 0>} : vector<32x128xi32>
    %5 = tpu.iota {dimensions = array<i32: 1>} : vector<32x128xi32>
    %c128_i32 = arith.constant 128 : i32
    %6 = vector.broadcast %c128_i32 : i32 to vector<32x128xi32>
    %7 = arith.muli %4, %6 : vector<32x128xi32>
    %8 = arith.addi %7, %5 : vector<32x128xi32>
    %c0_i32 = arith.constant 0 : i32
    %9 = vector.broadcast %c0_i32 : i32 to vector<32x128xi32>
    %10 = arith.addi %8, %9 : vector<32x128xi32>
    %c16_i32 = arith.constant 16 : i32
    %11 = vector.broadcast %c16_i32 : i32 to vector<32x128xi32>
    %12 = arith.shrui %10, %11 : vector<32x128xi32>
    %13 = arith.xori %10, %12 : vector<32x128xi32>
    %c2146121005_i32 = arith.constant 2146121005 : i32
    %14 = vector.broadcast %c2146121005_i32 : i32 to vector<32x128xi32>
    %15 = arith.muli %13, %14 : vector<32x128xi32>
    %c15_i32 = arith.constant 15 : i32
    %16 = vector.broadcast %c15_i32 : i32 to vector<32x128xi32>
    %17 = arith.shrui %15, %16 : vector<32x128xi32>
    %18 = arith.xori %15, %17 : vector<32x128xi32>
    %c-2073254261_i32 = arith.constant -2073254261 : i32
    %19 = vector.broadcast %c-2073254261_i32 : i32 to vector<32x128xi32>
    %20 = arith.muli %18, %19 : vector<32x128xi32>
    %c16_i32_5 = arith.constant 16 : i32
    %21 = vector.broadcast %c16_i32_5 : i32 to vector<32x128xi32>
    %22 = arith.shrui %20, %21 : vector<32x128xi32>
    %23 = arith.xori %20, %22 : vector<32x128xi32>
    %c8_i32 = arith.constant 8 : i32
    %24 = vector.broadcast %c8_i32 : i32 to vector<32x128xi32>
    %25 = arith.shrui %23, %24 : vector<32x128xi32>
    %26 = arith.sitofp %25 : vector<32x128xi32> to vector<32x128xf32>
    %cst_6 = arith.constant 5.96046448E-8 : f32
    %27 = vector.broadcast %cst_6 : f32 to vector<32x128xf32>
    %28 = arith.mulf %26, %27 : vector<32x128xf32>
    %29 = arith.cmpf ole, %28, %2 : vector<32x128xf32>
    %30 = arith.extui %29 : vector<32x128xi1> to vector<32x128xi32>
    %31 = arith.sitofp %30 : vector<32x128xi32> to vector<32x128xf32>
    %c0_7 = arith.constant 0 : index
    %c0_8 = arith.constant 0 : index
    %c0_9 = arith.constant 0 : index
    %32 = vector.load %arg3[%c0_7, %c0_8, %c0_9] : memref<4x32x128xf32, #tpu.memory_space<vmem>>, vector<1x32x128xf32>
    %33 = vector.shape_cast %32 : vector<1x32x128xf32> to vector<32x128xf32>
    %34 = vector.shape_cast %31 : vector<32x128xf32> to vector<1x32x128xf32>
    tpu.vector_store %arg3[%c0_7, %c0_8, %c0_9], %34 {strides = array<i32>} : memref<4x32x128xf32, #tpu.memory_space<vmem>>, vector<1x32x128xf32>,
    %c1 = arith.constant 1 : index
    %c0_10 = arith.constant 0 : index
    %c0_11 = arith.constant 0 : index
    %35 = vector.load %arg3[%c1, %c0_10, %c0_11] : memref<4x32x128xf32, #tpu.memory_space<vmem>>, vector<1x32x128xf32>
    %36 = vector.shape_cast %35 : vector<1x32x128xf32> to vector<32x128xf32>
    %37 = vector.shape_cast %31 : vector<32x128xf32> to vector<1x32x128xf32>
    tpu.vector_store %arg3[%c1, %c0_10, %c0_11], %37 {strides = array<i32>} : memref<4x32x128xf32, #tpu.memory_space<vmem>>, vector<1x32x128xf32>,
    %c2 = arith.constant 2 : index
    %c0_12 = arith.constant 0 : index
    %c0_13 = arith.constant 0 : index
    %38 = vector.load %arg3[%c2, %c0_12, %c0_13] : memref<4x32x128xf32, #tpu.memory_space<vmem>>, vector<1x32x128xf32>
    %39 = vector.shape_cast %38 : vector<1x32x128xf32> to vector<32x128xf32>
    %40 = vector.shape_cast %31 : vector<32x128xf32> to vector<1x32x128xf32>
    tpu.vector_store %arg3[%c2, %c0_12, %c0_13], %40 {strides = array<i32>} : memref<4x32x128xf32, #tpu.memory_space<vmem>>, vector<1x32x128xf32>,
    %c3 = arith.constant 3 : index
    %c0_14 = arith.constant 0 : index
    %c0_15 = arith.constant 0 : index
    %41 = vector.load %arg3[%c3, %c0_14, %c0_15] : memref<4x32x128xf32, #tpu.memory_space<vmem>>, vector<1x32x128xf32>
    %42 = vector.shape_cast %41 : vector<1x32x128xf32> to vector<32x128xf32>
    %43 = vector.shape_cast %31 : vector<32x128xf32> to vector<1x32x128xf32>
    tpu.vector_store %arg3[%c3, %c0_14, %c0_15], %43 {strides = array<i32>} : memref<4x32x128xf32, #tpu.memory_space<vmem>>, vector<1x32x128xf32>,
    return
  }
}

</mosaic_0001>

<bundles_post_ra>
// kernel: tpu_custom_call.1
= control target key start
LH: loop header
LB: loop body
LE: loop exit
PB: predicated region body
PF: predicated region fallthrough
CT: control target
= control target key end

     0   :  { %9 = vsyncpa [#allocation3], 0  ;;  %vm22_vm0 = vcmask 195584   ;;  %s422_s0 = inlined_call_operand.vmem [shape: f32[32,24], index: 0, kind: input, shape index: {}]   ;;  %s423_s1 = inlined_call_operand.vmem [shape: f32[24,128], index: 1, kind: input, shape index: {}]   ;;  %s424_s2 = inlined_call_operand.hbm [shape: f32[32,128], index: 2, kind: output, shape index: {0}]   ;;  %s425_s3 = inlined_call_operand.hbm [shape: f32[4,32,128], index: 3, kind: output, shape index: {1}]  }
   0x1   :  { %v19_v0 = vld [vmem:[%s423_s1] sm:$0xff]  ;;  %v20_v1 = vld [vmem:[%s423_s1 + $0x8] sm:$0xff]  ;;  %v17_v4 = vld [vmem:[%s422_s0 + $0x10] sm:$0xff] }
   0x2   :  { %v273_v2 = vpack.c.bf16 %v20_v1, %v19_v0  ;;  %v15_v3 = vld [vmem:[%s422_s0] sm:$0xff]  ;;  %v21_v5 = vld [vmem:[%s423_s1 + $0x10] sm:$0xff]  ;;  %270 = vmatprep.mubr.msk.f32.mxu1 %vm22_vm0, %v17_v4 }
   0x3   :  { %267 = vmatprep.mubr.msk.f32.mxu0 %vm22_vm0, %v15_v3 }
   0x4   :  { %10 = vsyncpa [#allocation5], 0  ;;  %274 = vmatprep.subr.bf16.mxu0 %v273_v2  ;;  %277 = vmatprep.subr.bf16.mxu1 %v273_v2  ;;  %v16_v6 = vld [vmem:[%s422_s0 + $0x8] sm:$0xff]  ;;  %v18_v7 = vld [vmem:[%s422_s0 + $0x18] sm:$0xff]  ;;  %v124_v8 = vlaneseq  ;;  %s334_s0 = smov [#allocation2]   ;;  %s335_s26 = smov [#allocation4]  }
   0x5   :  { %276 = vmatpush3.bf16.msra.mxu0 %v273_v2  ;;  %279 = vmatpush3.bf16.msra.mxu1 %v273_v2  ;;  %s219_s1 = sshll.u32 %s334_s0, 4  ;;  %s231_s27 = sshll.u32 %s335_s26, 4  ;;  %s384_s1 = int_to_ptr.vmem [resolvable:$true] %s219_s1  ;;  %s386_s27 = int_to_ptr.vmem [resolvable:$true] %s231_s27 }
   0x6   :  { %265 = vmatprep.subr.mxu0 %v21_v5  ;;  %278 = vmatprep.subr.mxu1 %v21_v5  ;;  %v125_v9 = vshrl.u32 %v124_v8, 7  ;;  %v130_v13 = vand.u32 127, %v124_v8  ;;  %s286_s28 = scalar_lea.vmem %s384_s1, 512  ;;  %p291_p1 = scmp.lt.s32.totalorder %s384_s1, %s384_s1 }
   0x7   :  { %p287_p0 = scmp.ne.s32.totalorder %s384_s1, %s286_s28  ;;  %p292_p2 = scmp.lt.s32.totalorder %s286_s28, %s286_s28 }
   0x8   :  { %v126_v10 = vadd.s32 8, %v125_v9  ;;  %v128_v11 = vadd.s32 24, %v125_v9  ;;  %v127_v12 = vadd.s32 16, %v125_v9  ;;  %v131_v16 = vmul.u32 128, %v125_v9 }
   0x9   :  { %266 = vmatpush3.msra.mxu0 %v21_v5  ;;  %280 = vmatpush3.msra.mxu1 %v21_v5  ;;  %p293_p3 = por %p292_p2, %p291_p1 }
   0xa   :  { %268 = vmatmul.mubr.msk.f32.vlgmr.msra.gmra.mrb[0].mxu0 %vm22_vm0, %v16_v6  ;;  %271 = vmatmul.mubr.msk.f32.vlgmr.msra.gmra.mrb[0].mxu1 %vm22_vm0, %v18_v7  ;;  %v132_v14 = vmul.u32 128, %v126_v10  ;;  %v134_v15 = vmul.u32 128, %v128_v11  ;;  %v135_v20 = vadd.s32 %v131_v16, %v130_v13  ;;  %v336_v6 = vmov 0.0  }
   0xb   :  { %v133_v17 = vmul.u32 128, %v127_v12  ;;  %p294_p4 = pnand %p293_p3, %p287_p0 }
   0xc   :  { %v136_v18 = vadd.s32 %v132_v14, %v130_v13  ;;  %v138_v19 = vadd.s32 %v134_v15, %v130_v13  ;;  %v139_v24 = vshrl.u32 %v135_v20, 16 }
   0xd   :  { %v137_v21 = vadd.s32 %v133_v17, %v130_v13 }
   0xe   :  { %v140_v22 = vshrl.u32 %v136_v18, 16  ;;  %v142_v23 = vshrl.u32 %v138_v19, 16  ;;  %v143_v28 = vxor.u32 %v139_v24, %v135_v20 }
   0xf   :  { %v141_v25 = vshrl.u32 %v137_v21, 16 }
  0x10   :  { %v144_v26 = vxor.u32 %v140_v22, %v136_v18  ;;  %v146_v27 = vxor.u32 %v142_v23, %v138_v19  ;;  %v147_v32 = vmul.u32 2146121005, %v143_v28 }
  0x11   :  { %v145_v29 = vxor.u32 %v141_v25, %v137_v21 }
  0x12   :  { %v148_v30 = vmul.u32 2146121005, %v144_v26  ;;  %v150_v31 = vmul.u32 2146121005, %v146_v27  ;;  %v151_v36 = vshrl.u32 %v147_v32, 15 }
  0x13   :  { %v149_v33 = vmul.u32 2146121005, %v145_v29 }
  0x14   :  { %v152_v34 = vshrl.u32 %v148_v30, 15  ;;  %v154_v35 = vshrl.u32 %v150_v31, 15  ;;  %v155_v40 = vxor.u32 %v151_v36, %v147_v32 }
  0x15   :  { %v153_v37 = vshrl.u32 %v149_v33, 15 }
  0x16   :  { %v156_v38 = vxor.u32 %v152_v34, %v148_v30  ;;  %v158_v39 = vxor.u32 %v154_v35, %v150_v31  ;;  %v159_v44 = vmul.u32 2221713035, %v155_v40 }
  0x17   :  { %v157_v41 = vxor.u32 %v153_v37, %v149_v33 }
  0x18   :  { %v160_v42 = vmul.u32 2221713035, %v156_v38  ;;  %v162_v43 = vmul.u32 2221713035, %v158_v39  ;;  %v163_v48 = vshrl.u32 %v159_v44, 16 }
  0x19   :  { %v161_v45 = vmul.u32 2221713035, %v157_v41 }
  0x1a   :  { %v164_v46 = vshrl.u32 %v160_v42, 16  ;;  %v166_v47 = vshrl.u32 %v162_v43, 16  ;;  %v167_v52 = vxor.u32 %v163_v48, %v159_v44 }
  0x1b   :  { %v165_v49 = vshrl.u32 %v161_v45, 16 }
  0x1c   :  { %v168_v50 = vxor.u32 %v164_v46, %v160_v42  ;;  %v170_v51 = vxor.u32 %v166_v47, %v162_v43  ;;  %v171_v56 = vshrl.u32 %v167_v52, 8 }
  0x1d   :  { %v169_v53 = vxor.u32 %v165_v49, %v161_v45 }
  0x1e   :  { %v172_v54 = vshrl.u32 %v168_v50, 8  ;;  %v174_v55 = vshrl.u32 %v170_v51, 8  ;;  %v175_v60 = vcvt.s32.f32 %v171_v56 }
  0x1f   :  { %v173_v57 = vshrl.u32 %v169_v53, 8 }
  0x20   :  { %v176_v58 = vcvt.s32.f32 %v172_v54  ;;  %v178_v59 = vcvt.s32.f32 %v174_v55  ;;  %v179_v0 = vmul.f32 5.9604645e-08, %v175_v60 }
  0x21   :  { %v177_v61 = vcvt.s32.f32 %v173_v57 }
  0x22   :  { %v180_v62 = vmul.f32 5.9604645e-08, %v176_v58  ;;  %v182_v63 = vmul.f32 5.9604645e-08, %v178_v59 }
  0x23   :  { %v181_v1 = vmul.f32 5.9604645e-08, %v177_v61 }
  0xdd   :  { %v269_v2 = vpop.f32.mrb[0].mxu0  ;;  %v272_v3 = vpop.f32.mrb[0].mxu1 }
  0xde   :  { %121 = vst [vmem:[#allocation2 + $0x8] sm:$0xff] %v269_v2  ;;  %vm184_vm1 = vcmp.le.f32.partialorder %v180_v62, %v269_v2  ;;  %123 = vst [vmem:[#allocation2 + $0x18] sm:$0xff] %v272_v3  ;;  %vm186_vm2 = vcmp.le.f32.partialorder %v182_v63, %v272_v3  ;;  %v101_v4 = vpop.f32.mrb[1].mxu0  ;;  %v111_v5 = vpop.f32.mrb[1].mxu1 }
  0xdf   :  { %v251_v7 = vsel %vm184_vm1, 1.0, %v336_v6  ;;  %v253_v8 = vsel %vm186_vm2, 1.0, %v336_v6  ;;  %120 = vst [vmem:[#allocation2] sm:$0xff] %v101_v4  ;;  %vm183_vm3 = vcmp.le.f32.partialorder %v179_v0, %v101_v4  ;;  %122 = vst [vmem:[#allocation2 + $0x10] sm:$0xff] %v111_v5  ;;  %vm185_vm4 = vcmp.le.f32.partialorder %v181_v1, %v111_v5 }
  0xe0   :  { %196 = vst [vmem:[#allocation4 + $0x8] sm:$0xff] %v251_v7  ;;  %201 = vst [vmem:[#allocation4 + $0x28] sm:$0xff] %v251_v7  ;;  %v250_v9 = vsel %vm183_vm3, 1.0, %v336_v6  ;;  %v252_v10 = vsel %vm185_vm4, 1.0, %v336_v6 }
  0xe1   :  { %206 = vst [vmem:[#allocation4 + $0x48] sm:$0xff] %v251_v7  ;;  %211 = vst [vmem:[#allocation4 + $0x68] sm:$0xff] %v251_v7 }
  0xe2   :  { %198 = vst [vmem:[#allocation4 + $0x18] sm:$0xff] %v253_v8  ;;  %203 = vst [vmem:[#allocation4 + $0x38] sm:$0xff] %v253_v8 }
  0xe3   :  { %208 = vst [vmem:[#allocation4 + $0x58] sm:$0xff] %v253_v8  ;;  %213 = vst [vmem:[#allocation4 + $0x78] sm:$0xff] %v253_v8 }
  0xe4   :  { %297 = shalt.err (!%p294_p4)
}
  0xe5   :  { %s298_s4 = scalar_lea.hbm %s424_s2, 512 }
  0xe6   :  { %p299_p5 = scmp.ne.s32.totalorder %s424_s2, %s298_s4  ;;  %p302_p6 = scmp.lt.u32.totalorder %s298_s4, %s424_s2 }
  0xe8   :  { %p304_p7 = pnand %p302_p6, %p299_p5 }
  0xea   :  { %307 = shalt.err (!%p304_p7)
}
  0xeb   :  { %s337_s9 = smov 128   ;;  %s338_s10 = smov 8   ;;  %195 = vst [vmem:[#allocation4] sm:$0xff] %v250_v9  ;;  %200 = vst [vmem:[#allocation4 + $0x20] sm:$0xff] %v250_v9 }
  0xec   :  { %225 = dma.vmem_to_hbm [thread:$0]  %s384_s1, 512, %s424_s2, [#allocation3], %s337_s9, %s337_s9, %s338_s10   ;;  %205 = vst [vmem:[#allocation4 + $0x40] sm:$0xff] %v250_v9  ;;  %210 = vst [vmem:[#allocation4 + $0x60] sm:$0xff] %v250_v9 }
  0xed   :  { %197 = vst [vmem:[#allocation4 + $0x10] sm:$0xff] %v252_v10  ;;  %202 = vst [vmem:[#allocation4 + $0x30] sm:$0xff] %v252_v10  ;;  %s308_s13 = scalar_lea.vmem %s386_s27, 2048  ;;  %p313_p9 = scmp.lt.s32.totalorder %s386_s27, %s386_s27 }
  0xee   :  { %207 = vst [vmem:[#allocation4 + $0x50] sm:$0xff] %v252_v10  ;;  %212 = vst [vmem:[#allocation4 + $0x70] sm:$0xff] %v252_v10  ;;  %p309_p8 = scmp.ne.s32.totalorder %s386_s27, %s308_s13  ;;  %p314_p10 = scmp.lt.s32.totalorder %s308_s13, %s308_s13 }
  0xf0   :  { %p315_p11 = por %p314_p10, %p313_p9 }
  0xf2   :  { %p316_p12 = pnand %p315_p11, %p309_p8 }
  0xf4   :  { %319 = shalt.err (!%p316_p12)
}
  0xf5   :  { %s320_s2 = scalar_lea.hbm %s425_s3, 2048 }
  0xf6   :  { %p321_p13 = scmp.ne.s32.totalorder %s425_s3, %s320_s2  ;;  %p324_p0 = scmp.lt.u32.totalorder %s320_s2, %s425_s3 }
  0xf8   :  { %p326_p1 = pnand %p324_p0, %p321_p13 }
  0xfa   :  { %329 = shalt.err (!%p326_p1)
}
  0xfb   :  { %237 = dma.vmem_to_hbm [thread:$0]  %s386_s27, 2048, %s425_s3, [#allocation5], %s337_s9, %s337_s9, %s338_s10  }
  0xfc   :  { %330 = dma.done.wait [#allocation3], 512  }
  0xfd   :  { %331 = vsyncadd [#allocation3], 4294966784 }
  0xfe   :  { %332 = dma.done.wait [#allocation5], 2048  }
  0xff   :  { %333 = vsyncadd [#allocation5], 4294965248 }
 0x100   :  { %244 = vsyncpa [#allocation3], 1 }
 0x101   :  { %245 = vsyncpa [#allocation5], 1 }

</bundles_post_ra>
